<compile_context>
chip_gen: v7x
topology: tpu7x:2x2x1
jax: 0.10.0
libtpu: 0.0.40
codegen_flags: <defaults>
</compile_context>

<pallas_src>
import functools
import math

import jax
import jax.numpy as jnp
from jax.experimental import pallas as pl
from jax.experimental.pallas import tpu as pltpu

_LANES = 128
_SUBLANES = 8


def _caps_normalize_kernel(x_ref, mask_ref, out_ref, *, eps):
    x = x_ref[...].astype(jnp.float32)                       # (tn, width)
    # Segmented (per-capsule) sum of squares via a block-diagonal mask matmul:
    # keeps everything 2-D with the feature axis last (layout friendly).
    ss = jnp.dot(x * x, mask_ref[...], preferred_element_type=jnp.float32)
    # F.normalize: x / max(||x||, eps)  ==  x * rsqrt(max(||x||^2, eps^2))
    inv = jax.lax.rsqrt(jnp.maximum(ss, eps * eps))
    out_ref[...] = (x * inv).astype(out_ref.dtype)


def _round_up(v, m):
    return (v + m - 1) // m * m


def _block_diag_mask(width, delta_d):
    cap_id = jnp.arange(width, dtype=jnp.int32) // delta_d
    return (cap_id[:, None] == cap_id[None, :]).astype(jnp.float32)


def _normalize_ref(x, num_caps, eps=1e-12):
    """Pure-JAX reference (also the tiny-input bypass path)."""
    n, d = x.shape
    delta_d = d // num_caps
    xr = x.reshape(n, num_caps, delta_d).astype(jnp.float32)
    nrm = jnp.maximum(jnp.sqrt(jnp.sum(xr * xr, axis=2, keepdims=True)), eps)
    return (xr / nrm).reshape(n, d).astype(x.dtype)


def _run_slab(slab, delta_d, *, row_tile, eps, vmem_limit_bytes):
    """Normalize each contiguous delta_d-wide capsule of a (rows, width) slab."""
    rows, width = slab.shape
    mask = _block_diag_mask(width, delta_d)

    # Tile: as large as comfortably fits VMEM; full rows when the slab is small.
    tn = min(_round_up(min(row_tile, rows), _SUBLANES), rows)
    # On big slabs make sure there are >= 2 grid steps so ("parallel",) shards
    # rows across both TensorCores on v7x (no-op on single-TC v5e/v6e).
    slab_bytes = rows * width * jnp.dtype(slab.dtype).itemsize
    if slab_bytes > (1 << 20) and pl.cdiv(rows, tn) < 2:
        tn = min(rows, _round_up(pl.cdiv(rows, 2), _SUBLANES))

    grid = (pl.cdiv(rows, tn),)
    kernel = functools.partial(_caps_normalize_kernel, eps=eps)

    return pl.pallas_call(
        kernel,
        grid=grid,
        in_specs=[
            pl.BlockSpec((tn, width), lambda i: (i, 0)),      # slab row tile
            pl.BlockSpec((width, width), lambda i: (0, 0)),   # mask: VMEM-resident
        ],
        out_specs=pl.BlockSpec((tn, width), lambda i: (i, 0)),
        out_shape=jax.ShapeDtypeStruct((rows, width), slab.dtype),
        input_output_aliases={0: 0},                          # reuse slab's HBM buffer
        compiler_params=pltpu.CompilerParams(
            dimension_semantics=("parallel",),
            vmem_limit_bytes=vmem_limit_bytes),
    )(slab, mask)


def gat_layer_forward(x, W, a, lap, *, num_caps, alpha=0.2,
                      row_tile=4096, eps=1e-12,
                      min_pallas_bytes=1 << 20, force_pallas=False,
                      vmem_limit_bytes=None):
    """Forward pass of GATLayer.  Returns the per-capsule normalized x.

    W / a / lap / alpha are accepted for interface parity with the module but
    are unused: the module computes Wh, e, h_prime from them and discards the
    results, returning only the normalized x.
    """
    del W, a, lap, alpha  # dead in the module's return value (intentional DCE)

    n, d = x.shape
    assert d % num_caps == 0
    delta_d = d // num_caps

    # Tiny-input bypass: launch + DMA setup dwarfs the work below ~1 MiB.
    nbytes = n * d * jnp.dtype(x.dtype).itemsize
    if nbytes < min_pallas_bytes and not force_pallas:
        return _normalize_ref(x, num_caps, eps)

    if _LANES % delta_d == 0:
        # Lane-dense path: flatten to (rows, 128).  Since delta_d | 128 and
        # every capsule starts at a multiple of delta_d in the flat layout,
        # no capsule straddles a 128-lane row; the (128, 128) block-diagonal
        # mask with delta_d-wide blocks gives the per-capsule sums of squares.
        total = n * d
        padded = _round_up(total, _LANES * _SUBLANES)
        flat = x.reshape(-1)
        if padded != total:
            flat = jnp.pad(flat, (0, padded - total))   # zero pad -> stays 0 after norm
        slab = flat.reshape(padded // _LANES, _LANES)
        out = _run_slab(slab, delta_d, row_tile=row_tile, eps=eps,
                        vmem_limit_bytes=vmem_limit_bytes)
        return out.reshape(-1)[:total].reshape(n, d)

    # TODO(synk): when delta_d does not divide 128, capsules would straddle
    # lane rows; fall back to a (n, d) slab (accepts masked vst on the last dim).
    rows = _round_up(n, _SUBLANES)
    xp = x if rows == n else jnp.pad(x, ((0, rows - n), (0, 0)))
    out = _run_slab(xp, delta_d, row_tile=row_tile, eps=eps,
                    vmem_limit_bytes=vmem_limit_bytes)
    return out[:n]


if __name__ == "__main__":
    key = jax.random.PRNGKey(0)
    n, d, num_caps = 8, 32, 4
    alpha = 0.2

    kx, kw, ka, kl, kx2 = jax.random.split(key, 5)
    x = jax.random.normal(kx, (n, d), dtype=jnp.float32)

    # Deterministic xavier_uniform-style init (gain = 1.414), matching the
    # module's parameter shapes: W (d, d), a (2d, 1).  Unused by the output.
    bw = 1.414 * math.sqrt(6.0 / (d + d))
    W = jax.random.uniform(kw, (d, d), jnp.float32, minval=-bw, maxval=bw)
    ba = 1.414 * math.sqrt(6.0 / (2 * d + 1))
    a = jax.random.uniform(ka, (2 * d, 1), jnp.float32, minval=-ba, maxval=ba)
    lap = jax.random.normal(kl, (n, n), dtype=jnp.float32)

    # 1) Module-sized case, forced through the Pallas path.
    out = gat_layer_forward(x, W, a, lap, num_caps=num_caps, alpha=alpha,
                            force_pallas=True)
    out = jax.block_until_ready(out)
    ref = _normalize_ref(x, num_caps)
    assert out.shape == (n, d)
    assert jnp.allclose(out, ref, atol=1e-5, rtol=1e-5), "small-case mismatch"

    # 2) Larger case exercising multiple lane-dense row tiles, a partial last
    #    tile, and flat-length padding (lap unused, pass a dummy).
    n2 = 4100
    x2 = jax.random.normal(kx2, (n2, d), dtype=jnp.float32)
    out2 = gat_layer_forward(x2, W, a, jnp.zeros((1, 1), jnp.float32),
                             num_caps=num_caps, alpha=alpha,
                             force_pallas=True, row_tile=256)
    out2 = jax.block_until_ready(out2)
    ref2 = _normalize_ref(x2, num_caps)
    assert jnp.allclose(out2, ref2, atol=1e-5, rtol=1e-5), "tiled-case mismatch"

    print("KERNEL_OK")
</pallas_src>

<mosaic_0001>
module attributes {stable_mosaic.version = 11 : i64} {
  func.func @_caps_normalize_kernel(%arg0: i32, %arg1: memref<8x128xf32, #tpu.memory_space<vmem>>, %arg2: memref<128x128xf32, #tpu.memory_space<vmem>>, %arg3: memref<8x128xf32, #tpu.memory_space<vmem>>) attributes {dimension_semantics = [#tpu.dimension_semantics<parallel>], iteration_bounds = array<i64: 1>, scalar_prefetch = 0 : i64, scratch_operands = 0 : i64, tpu.core_type = #tpu.core_type<tc>, window_params = [{transform_indices = @transform_0, window_bounds = array<i64: 8, 128>}, {pipeline_mode = #tpu.pipeline_mode<synchronous>, transform_indices = @transform_1, window_bounds = array<i64: 128, 128>}, {transform_indices = @transform_2, window_bounds = array<i64: 8, 128>}]} {
    %c0 = arith.constant 0 : index
    %c0_0 = arith.constant 0 : index
    %0 = vector.load %arg1[%c0, %c0_0] : memref<8x128xf32, #tpu.memory_space<vmem>>, vector<8x128xf32>
    %1 = arith.mulf %0, %0 : vector<8x128xf32>
    %c0_1 = arith.constant 0 : index
    %c0_2 = arith.constant 0 : index
    %2 = vector.load %arg2[%c0_1, %c0_2] : memref<128x128xf32, #tpu.memory_space<vmem>>, vector<128x128xf32>
    %cst = arith.constant dense<0.000000e+00> : vector<8x128xf32>
    %3 = tpu.matmul %1, %2, %cst {dimension_numbers = #tpu.dot_dimension_numbers<[1], [0], [0], [1], [0, 0, 1, 1], [], []>} : vector<8x128xf32>, vector<128x128xf32>, vector<8x128xf32> -> vector<8x128xf32>
    %cst_3 = arith.constant 1.000000e-24 : f32
    %4 = vector.broadcast %cst_3 : f32 to vector<8x128xf32>
    %5 = arith.maximumf %3, %4 : vector<8x128xf32>
    %6 = math.rsqrt %5 : vector<8x128xf32>
    %7 = arith.mulf %0, %6 : vector<8x128xf32>
    %c0_4 = arith.constant 0 : index
    %c0_5 = arith.constant 0 : index
    %8 = vector.load %arg3[%c0_4, %c0_5] : memref<8x128xf32, #tpu.memory_space<vmem>>, vector<8x128xf32>
    tpu.vector_store %arg3[%c0_4, %c0_5], %7 {strides = array<i32>} : memref<8x128xf32, #tpu.memory_space<vmem>>, vector<8x128xf32>,
    return
  }
  func.func @transform_0(%arg0: i32) -> (i32, i32) {
    %c0_i32 = arith.constant 0 : i32
    %c0_i32_0 = arith.constant 0 : i32
    return %arg0, %c0_i32 : i32, i32
  }
  func.func @transform_1(%arg0: i32) -> (i32, i32) {
    %c0_i32 = arith.constant 0 : i32
    %c0_i32_0 = arith.constant 0 : i32
    %c0_i32_1 = arith.constant 0 : i32
    return %c0_i32, %c0_i32_0 : i32, i32
  }
  func.func @transform_2(%arg0: i32) -> (i32, i32) {
    %c0_i32 = arith.constant 0 : i32
    %c0_i32_0 = arith.constant 0 : i32
    return %arg0, %c0_i32 : i32, i32
  }
}

</mosaic_0001>

<bundles_post_ra>
// kernel: tpu_custom_call.1
= control target key start
LH: loop header
LB: loop body
LE: loop exit
PB: predicated region body
PF: predicated region fallthrough
CT: control target
= control target key end

     0   :  { %7 = vsyncpa [#allocation3], 0  ;;  %s370_s0 = inlined_call_operand.hbm [shape: f32[8,128], index: 0, kind: input, shape index: {}, may-alias: {0,2}]   ;;  %s371_s1 = inlined_call_operand.hbm [shape: f32[128,128], index: 1, kind: input, shape index: {}]   ;;  %s372_s2 = inlined_call_operand.hbm [shape: f32[8,128], index: 2, kind: output, shape index: {}, may-alias: {0,2}]  }
   0x1   :  { %8 = vsyncpa [#allocation6], 0 }
   0x2   :  { %9 = vsyncpa [#allocation4], 0  ;;  %s304_s9 = smov [#allocation2]   ;;  %s305_s11 = smov [#allocation5]  }
   0x3   :  { %s16_s10 = sshll.u32 %s304_s9, 4  ;;  %s25_s12 = sshll.u32 %s305_s11, 4  ;;  %s17_s10 = int_to_ptr.vmem [resolvable:$true] %s16_s10  ;;  %s327_s12 = int_to_ptr.vmem [resolvable:$true] %s25_s12 }
   0x4   :  { %s232_s15 = scalar_lea.hbm %s370_s0, 128 }
   0x5   :  { %p233_p0 = scmp.ne.s32.totalorder %s370_s0, %s232_s15  ;;  %p236_p1 = scmp.lt.u32.totalorder %s232_s15, %s370_s0 }
   0x7   :  { %p238_p2 = pnand %p236_p1, %p233_p0 }
   0x9   :  { %241 = shalt.err (!%p238_p2)
}
   0xa   :  { %s242_s20 = scalar_lea.vmem %s17_s10, 128  ;;  %p247_p4 = scmp.lt.s32.totalorder %s17_s10, %s17_s10 }
   0xb   :  { %p243_p3 = scmp.ne.s32.totalorder %s17_s10, %s242_s20  ;;  %p248_p5 = scmp.lt.s32.totalorder %s242_s20, %s242_s20 }
   0xd   :  { %p249_p6 = por %p248_p5, %p247_p4 }
   0xf   :  { %p250_p7 = pnand %p249_p6, %p243_p3 }
  0x11   :  { %253 = shalt.err (!%p250_p7)
}
  0x12   :  { %19 = dma.hbm_to_vmem [thread:$0]  %s370_s0, 128, %s17_s10, [#allocation3]  }
  0x13   :  { %s254_s25 = scalar_lea.hbm %s371_s1, 2048 }
  0x14   :  { %p255_p8 = scmp.ne.s32.totalorder %s371_s1, %s254_s25  ;;  %p258_p9 = scmp.lt.u32.totalorder %s254_s25, %s371_s1 }
  0x16   :  { %p260_p10 = pnand %p258_p9, %p255_p8 }
  0x18   :  { %263 = shalt.err (!%p260_p10)
}
  0x19   :  { %s264_s30 = scalar_lea.vmem %s327_s12, 2048  ;;  %p269_p12 = scmp.lt.s32.totalorder %s327_s12, %s327_s12 }
  0x1a   :  { %p265_p11 = scmp.ne.s32.totalorder %s327_s12, %s264_s30  ;;  %p270_p13 = scmp.lt.s32.totalorder %s264_s30, %s264_s30 }
  0x1c   :  { %p271_p0 = por %p270_p13, %p269_p12 }
  0x1e   :  { %p272_p1 = pnand %p271_p0, %p265_p11 }
  0x20   :  { %275 = shalt.err (!%p272_p1)
}
  0x21   :  { %s306_s0 = smov 128   ;;  %s307_s3 = smov 8  }
  0x22   :  { %31 = dma.hbm_to_vmem [thread:$0]  %s371_s1, 2048, %s327_s12, [#allocation6], %s306_s0, %s306_s0, %s307_s3  }
  0x23   :  { %298 = dma.done.wait [#allocation3], 128  }
  0x24   :  { %299 = vsyncadd [#allocation3], 4294967168 }
  0x25   :  { %300 = dma.done.wait [#allocation6], 2048  }
  0x26   :  { %301 = vsyncadd [#allocation6], 4294965248  ;;  %v308_v0 = vmov 0.0|0.0   ;;  %vm309_vm0 = vmmov 0   ;;  %v310_v1 = vmov 0.0   ;;  %v40_v2 = vld [vmem:[#allocation5] sm:$0xff] }
  0x27   :  { %198 = vmatprep.subr.bf16.mxu0 %v308_v0  ;;  %195 = vmatprep.mubr.msk.f32.mxu0 %vm309_vm0, %v310_v1  ;;  %v41_v3 = vld [vmem:[#allocation5 + $0x8] sm:$0xff]  ;;  %v42_v4 = vld [vmem:[#allocation5 + $0x10] sm:$0xff]  ;;  %v43_v6 = vld [vmem:[#allocation5 + $0x18] sm:$0xff]  ;;  %s311_s1 = smov [#allocation7]  }
  0x28   :  { %v199_v5 = vpack.c.bf16 %v41_v3, %v40_v2  ;;  %v202_v7 = vpack.c.bf16 %v43_v6, %v42_v4  ;;  %v44_v8 = vld [vmem:[#allocation5 + $0x20] sm:$0xff]  ;;  %v45_v9 = vld [vmem:[#allocation5 + $0x28] sm:$0xff]  ;;  %v46_v11 = vld [vmem:[#allocation5 + $0x30] sm:$0xff]  ;;  %s136_s6 = sshll.u32 %s311_s1, 4  ;;  %s137_s6 = int_to_ptr.vmem [resolvable:$true] %s136_s6 }
  0x29   :  { %v205_v10 = vpack.c.bf16 %v45_v9, %v44_v8  ;;  %v47_v12 = vld [vmem:[#allocation5 + $0x38] sm:$0xff]  ;;  %v48_v14 = vld [vmem:[#allocation5 + $0x40] sm:$0xff]  ;;  %v49_v15 = vld [vmem:[#allocation5 + $0x48] sm:$0xff]  ;;  %s276_s7 = scalar_lea.vmem %s137_s6, 128  ;;  %p281_p3 = scmp.lt.s32.totalorder %s137_s6, %s137_s6 }
  0x2a   :  { %200 = vmatpush3.bf16.msra.mxu0 %v199_v5  ;;  %v208_v13 = vpack.c.bf16 %v47_v12, %v46_v11  ;;  %v211_v16 = vpack.c.bf16 %v49_v15, %v48_v14  ;;  %v50_v17 = vld [vmem:[#allocation5 + $0x50] sm:$0xff]  ;;  %v51_v18 = vld [vmem:[#allocation5 + $0x58] sm:$0xff]  ;;  %v52_v20 = vld [vmem:[#allocation5 + $0x60] sm:$0xff]  ;;  %p277_p2 = scmp.ne.s32.totalorder %s137_s6, %s276_s7  ;;  %p282_p4 = scmp.lt.s32.totalorder %s276_s7, %s276_s7 }
  0x2b   :  { %201 = vmatprep.subr.bf16.mxu0 %v308_v0  ;;  %v214_v19 = vpack.c.bf16 %v51_v18, %v50_v17  ;;  %v53_v21 = vld [vmem:[#allocation5 + $0x68] sm:$0xff]  ;;  %v54_v23 = vld [vmem:[#allocation5 + $0x70] sm:$0xff]  ;;  %v55_v24 = vld [vmem:[#allocation5 + $0x78] sm:$0xff] }
  0x2c   :  { %v217_v22 = vpack.c.bf16 %v53_v21, %v52_v20  ;;  %v220_v25 = vpack.c.bf16 %v55_v24, %v54_v23  ;;  %v38_v26 = vld [vmem:[#allocation2] sm:$0xff]  ;;  %p283_p5 = por %p282_p4, %p281_p3 }
  0x2d   :  { %v39_v27 = vmul.f32 %v38_v26, %v38_v26 }
  0x2e   :  { %203 = vmatpush3.bf16.msra.mxu0 %v202_v7  ;;  %p284_p6 = pnand %p283_p5, %p277_p2 }
  0x2f   :  { %204 = vmatprep.subr.bf16.mxu0 %v308_v0 }
  0x32   :  { %206 = vmatpush3.bf16.msra.mxu0 %v205_v10 }
  0x33   :  { %207 = vmatprep.subr.bf16.mxu0 %v308_v0 }
  0x36   :  { %209 = vmatpush3.bf16.msra.mxu0 %v208_v13 }
  0x37   :  { %210 = vmatprep.subr.bf16.mxu0 %v308_v0 }
  0x3a   :  { %212 = vmatpush3.bf16.msra.mxu0 %v211_v16 }
  0x3b   :  { %213 = vmatprep.subr.bf16.mxu0 %v308_v0 }
  0x3e   :  { %215 = vmatpush3.bf16.msra.mxu0 %v214_v19 }
  0x3f   :  { %216 = vmatprep.subr.bf16.mxu0 %v308_v0 }
  0x42   :  { %218 = vmatpush3.bf16.msra.mxu0 %v217_v22 }
  0x43   :  { %219 = vmatprep.subr.bf16.mxu0 %v308_v0 }
  0x46   :  { %221 = vmatpush3.bf16.msra.mxu0 %v220_v25 }
  0x49   :  { %196 = vmatmul.mubr.f32.vlgmr.msra.gmra.mrb[0].mxu0 %v39_v27 }
 0x11c   :  { %v122_v28 = vpop.f32.mrb[0].mxu0 }
 0x11d   :  { %v126_v29 = vmax.f32 %v122_v28, 1e-24  ;;  %v197_v30 = vpop.f32.mrb[1].mxu0 }
 0x11f   :  { %230 = vrsqrt.f32 %v126_v29 }
 0x129   :  { %v231_v31 = vpop.eup %230 }
 0x12a   :  { %v128_v32 = vmul.f32 %v231_v31, %v38_v26 }
 0x12c   :  { %129 = vst [vmem:[#allocation7] sm:$0xff] %v128_v32 }
 0x12d   :  { %287 = shalt.err (!%p284_p6)
}
 0x12e   :  { %s288_s10 = scalar_lea.hbm %s372_s2, 128 }
 0x12f   :  { %p289_p7 = scmp.ne.s32.totalorder %s372_s2, %s288_s10  ;;  %p292_p8 = scmp.lt.u32.totalorder %s288_s10, %s372_s2 }
 0x131   :  { %p294_p9 = pnand %p292_p8, %p289_p7 }
 0x133   :  { %297 = shalt.err (!%p294_p9)
}
 0x134   :  { %139 = dma.vmem_to_hbm [thread:$0]  %s137_s6, 128, %s372_s2, [#allocation4]  }
 0x135   :  { %302 = dma.done.wait [#allocation4], 128  }
 0x136   :  { %303 = vsyncadd [#allocation4], 4294967168 }
 0x137   :  { %143 = vsyncpa [#allocation3], 1 }
 0x138   :  { %144 = vsyncpa [#allocation6], 1 }
 0x139   :  { %145 = vsyncpa [#allocation4], 1 }

</bundles_post_ra>
